<compile_context>
chip_gen: v5e
topology: v5e:2x2
jax: 0.10.0
libtpu: 0.0.40
codegen_flags: <defaults>
</compile_context>

<pallas_src>
import functools

import jax
import jax.numpy as jnp
from jax.experimental import pallas as pl
from jax.experimental.pallas import tpu as pltpu

RESIZE = 224                      # F.interpolate(x, size=224)
FEAT_DIM = 128                    # synthetic stand-in for ResNet-50's 2048
K_FLAT = 3 * RESIZE * RESIZE      # 150528
TK_MAX = 21504                    # 150528 = 7 * 21504 ; 21504 = 168 * 128
STATS_LANES = 128                 # lane-dense stats output width


def _choose_tk(k):
    """Largest K tile: single tile if it fits, else a multiple-of-128 divisor."""
    if k <= TK_MAX:
        return k
    for cand in range(TK_MAX, 127, -128):
        if k % cand == 0:
            return cand
    # TODO(synk): awkward K with no multiple-of-128 divisor -> single huge tile.
    return k


# ---------------------------------------------------------------------------
# Fused kernel: bf16 matmul (K-tiled, accumulate into resident f32 output)
#               + MocoLoss epilogue on the last K step.
# ---------------------------------------------------------------------------
def moco_fused_kernel(lhs_ref, rhs_ref, feats_ref, stats_ref, *, n_valid, n_pad):
    kk = pl.program_id(0)

    @pl.when(kk == 0)
    def _():
        feats_ref[...] = jnp.zeros_like(feats_ref)

    # bf16 inputs, f32 accumulation directly into the VMEM-resident output.
    feats_ref[...] += jnp.dot(lhs_ref[...], rhs_ref[...],
                              preferred_element_type=jnp.float32)

    @pl.when(kk == pl.num_programs(0) - 1)
    def _():
        f = feats_ref[...]                       # (3*n_pad, D) f32, in VMEM
        xf = f[0:n_pad, :]
        yf = f[n_pad:2 * n_pad, :]
        yhf = f[2 * n_pad:3 * n_pad, :]

        def l2norm(v):                           # F.normalize(v, dim=1, eps=1e-12)
            ss = jnp.sum(v * v, axis=-1, keepdims=True)
            return v * jax.lax.rsqrt(jnp.maximum(ss, 1e-24))

        xf = l2norm(xf)
        yf = l2norm(yf)                          # .detach() is a no-op in forward
        yhf = l2norm(yhf)

        dt = jnp.sum(yhf * yf, axis=-1, keepdims=True)   # diff_target (n_pad, 1)
        di = jnp.sum(yhf * xf, axis=-1, keepdims=True)   # diff_input
        dv = jnp.sum(yf * xf, axis=-1, keepdims=True)    # diff_views

        # Mask out padded rows for the mean reductions.
        row = jax.lax.broadcasted_iota(jnp.int32, (n_pad, 1), 0)
        valid = (row < n_valid).astype(jnp.float32)
        inv_n = 1.0 / float(n_valid)
        loss = jnp.sum((1.0 - dt) * valid, axis=0, keepdims=True) * inv_n    # (1,1)
        simimp = jnp.sum((dt - dv) * valid, axis=0, keepdims=True) * inv_n   # (1,1)

        # Pack everything into one lane-dense (n_pad, 128) block:
        #   lane 0 = diff_target, 1 = diff_input, 2 = diff_views,
        #   lane 3 = loss (broadcast), lane 4 = sim_improvement (broadcast).
        lane = jax.lax.broadcasted_iota(jnp.int32, (n_pad, STATS_LANES), 1)
        packed = jnp.where(lane == 0, dt, 0.0)
        packed = jnp.where(lane == 1, di, packed)
        packed = jnp.where(lane == 2, dv, packed)
        packed = jnp.where(lane == 3, loss, packed)
        packed = jnp.where(lane == 4, simimp, packed)
        stats_ref[...] = packed


def fused_feat_loss(lhs, rhs, *, n_valid, n_pad):
    m, k = lhs.shape
    k2, d = rhs.shape
    assert k == k2 and m == 3 * n_pad
    tk = _choose_tk(k)
    assert k % tk == 0
    kernel = functools.partial(moco_fused_kernel, n_valid=n_valid, n_pad=n_pad)
    return pl.pallas_call(
        kernel,
        out_shape=(
            jax.ShapeDtypeStruct((m, d), jnp.float32),            # features
            jax.ShapeDtypeStruct((n_pad, STATS_LANES), jnp.float32),  # stats
        ),
        grid_spec=pltpu.PrefetchScalarGridSpec(
            num_scalar_prefetch=0,
            grid=(k // tk,),
            in_specs=[
                pl.BlockSpec((m, tk), lambda kk: (0, kk)),
                pl.BlockSpec((tk, d), lambda kk: (kk, 0)),
            ],
            out_specs=[
                pl.BlockSpec((m, d), lambda kk: (0, 0)),
                pl.BlockSpec((n_pad, STATS_LANES), lambda kk: (0, 0)),
            ],
        ),
        compiler_params=pltpu.CompilerParams(
            dimension_semantics=("arbitrary",),
            # Covers a double-buffered bf16 RHS tile of (21504, 128) on every
            # generation (v5e default scoped VMEM is only 16 MiB; v7x has
            # 64 MiB physical so stay well under it).
            vmem_limit_bytes=32 * 1024 * 1024,
        ),
    )(lhs, rhs)


# ---------------------------------------------------------------------------
# Plain-JAX glue: nearest resize, frozen-weight folding, batching, host logs.
# ---------------------------------------------------------------------------
def nearest_resize(x, size):
    # matches F.interpolate(x, size=224) default mode='nearest'
    _, _, h, w = x.shape
    hi = (jnp.arange(size) * h) // size
    wi = (jnp.arange(size) * w) // size
    return x[:, :, hi, :][:, :, :, wi]


def fold_weight(w_full, h, w_img):
    """Fold nearest-upsample-to-224 into the frozen projection weight.

    resized_flat @ W  ==  orig_flat @ W_folded, where W_folded sums the rows of
    W over all 224x224 output pixels that map to the same source pixel.
    """
    d = w_full.shape[1]
    hi = (jnp.arange(RESIZE) * h) // RESIZE
    wi = (jnp.arange(RESIZE) * w_img) // RESIZE
    sh = (hi[:, None] == jnp.arange(h)[None, :]).astype(jnp.float32)      # (224, h)
    sw = (wi[:, None] == jnp.arange(w_img)[None, :]).astype(jnp.float32)  # (224, w)
    w4 = w_full.reshape(3, RESIZE, RESIZE, d)
    wf = jnp.einsum('cabd,ah,bw->chwd', w4, sh, sw)
    return wf.reshape(3 * h * w_img, d)


def moco_loss_forward(y_hat, y, x, w_full):
    n, c, h, w_img = x.shape
    assert c == 3, "MOCO backbone expects RGB inputs"
    n_pad = max(8, ((n + 7) // 8) * 8)             # sublane-aligned row chunks

    use_fold = (c * h * w_img) <= w_full.shape[0]  # fold only if it shrinks K
    if use_fold:
        rhs = fold_weight(w_full, h, w_img).astype(jnp.bfloat16)

        def prep(img):
            return img.astype(jnp.float32).reshape(n, -1)
    else:
        rhs = w_full.astype(jnp.bfloat16)

        def prep(img):
            return nearest_resize(img.astype(jnp.float32), RESIZE).reshape(n, -1)

    def pad_rows(m):
        return jnp.pad(m, ((0, n_pad - n), (0, 0)))

    # Stacked LHS: [x ; y ; y_hat], each chunk padded to n_pad rows, bf16.
    lhs = jnp.concatenate(
        [pad_rows(prep(x)), pad_rows(prep(y)), pad_rows(prep(y_hat))],
        axis=0).astype(jnp.bfloat16)

    _feats, stats = fused_feat_loss(lhs, rhs, n_valid=n, n_pad=n_pad)

    # Single bulk device->host transfer; build sim_logs host-side.
    stats_host = jax.device_get(stats)
    sim_logs = [
        {'diff_target': float(stats_host[i, 0]),
         'diff_input': float(stats_host[i, 1]),
         'diff_views': float(stats_host[i, 2])}
        for i in range(n)
    ]
    loss = stats[0, 3]                       # device scalar, sum(1 - dt) / count
    sim_improvement = float(stats_host[0, 4])  # sum(dt - dv) / count
    return loss, sim_improvement, sim_logs


if __name__ == "__main__":
    key = jax.random.PRNGKey(0)
    k_x, k_y, k_yh, k_w = jax.random.split(key, 4)

    N, C, H, W = 2, 3, 16, 16
    x = jax.random.normal(k_x, (N, C, H, W), dtype=jnp.float32)
    y = jax.random.normal(k_y, (N, C, H, W), dtype=jnp.float32)
    y_hat = jax.random.normal(k_yh, (N, C, H, W), dtype=jnp.float32)

    # Deterministic synthetic frozen backbone weight (stand-in for MOCO ResNet-50).
    w_proj = (jax.random.normal(k_w, (K_FLAT, FEAT_DIM), dtype=jnp.float32)
              * (1.0 / float(K_FLAT) ** 0.5))

    loss, sim_improvement, sim_logs = moco_loss_forward(y_hat, y, x, w_proj)
    jax.block_until_ready(loss)

    print("KERNEL_OK")
</pallas_src>

<mosaic_0001>
module attributes {stable_mosaic.version = 11 : i64} {
  func.func @moco_fused_kernel(%arg0: i32, %arg1: memref<24x768xbf16, #tpu.memory_space<vmem>>, %arg2: memref<768x128xbf16, #tpu.memory_space<vmem>>, %arg3: memref<24x128xf32, #tpu.memory_space<vmem>>, %arg4: memref<8x128xf32, #tpu.memory_space<vmem>>) attributes {dimension_semantics = [#tpu.dimension_semantics<arbitrary>], iteration_bounds = array<i64: 1>, scalar_prefetch = 0 : i64, scratch_operands = 0 : i64, tpu.core_type = #tpu.core_type<tc>, window_params = [{transform_indices = @transform_0, window_bounds = array<i64: 24, 768>}, {transform_indices = @transform_1, window_bounds = array<i64: 768, 128>}, {pipeline_mode = #tpu.pipeline_mode<synchronous>, transform_indices = @transform_2, window_bounds = array<i64: 24, 128>}, {pipeline_mode = #tpu.pipeline_mode<synchronous>, transform_indices = @transform_3, window_bounds = array<i64: 8, 128>}]} {
    %c0_i32 = arith.constant 0 : i32
    %0 = arith.cmpi eq, %arg0, %c0_i32 : i32
    %1 = arith.extui %0 : i1 to i32
    %c0_i32_0 = arith.constant 0 : i32
    %2 = arith.cmpi ne, %1, %c0_i32_0 : i32
    scf.if %2 {
      %cst_10 = arith.constant 0.000000e+00 : f32
      %12 = vector.broadcast %cst_10 : f32 to vector<24x128xf32>
      %c0_11 = arith.constant 0 : index
      %c0_12 = arith.constant 0 : index
      %13 = vector.load %arg3[%c0_11, %c0_12] : memref<24x128xf32, #tpu.memory_space<vmem>>, vector<24x128xf32>
      tpu.vector_store %arg3[%c0_11, %c0_12], %12 {strides = array<i32>} : memref<24x128xf32, #tpu.memory_space<vmem>>, vector<24x128xf32>,
    } else {
    }
    %c0 = arith.constant 0 : index
    %c0_1 = arith.constant 0 : index
    %3 = vector.load %arg3[%c0, %c0_1] : memref<24x128xf32, #tpu.memory_space<vmem>>, vector<24x128xf32>
    %c0_2 = arith.constant 0 : index
    %c0_3 = arith.constant 0 : index
    %4 = vector.load %arg1[%c0_2, %c0_3] : memref<24x768xbf16, #tpu.memory_space<vmem>>, vector<24x768xbf16>
    %c0_4 = arith.constant 0 : index
    %c0_5 = arith.constant 0 : index
    %5 = vector.load %arg2[%c0_4, %c0_5] : memref<768x128xbf16, #tpu.memory_space<vmem>>, vector<768x128xbf16>
    %cst = arith.constant dense<0.000000e+00> : vector<24x128xf32>
    %6 = tpu.matmul %4, %5, %cst {dimension_numbers = #tpu.dot_dimension_numbers<[1], [0], [0], [1], [0, 0, 1, 1], [], []>} : vector<24x768xbf16>, vector<768x128xbf16>, vector<24x128xf32> -> vector<24x128xf32>
    %7 = arith.addf %3, %6 : vector<24x128xf32>
    %c0_6 = arith.constant 0 : index
    %c0_7 = arith.constant 0 : index
    %8 = vector.load %arg3[%c0_6, %c0_7] : memref<24x128xf32, #tpu.memory_space<vmem>>, vector<24x128xf32>
    tpu.vector_store %arg3[%c0_6, %c0_7], %7 {strides = array<i32>} : memref<24x128xf32, #tpu.memory_space<vmem>>, vector<24x128xf32>,
    %c0_i32_8 = arith.constant 0 : i32
    %9 = arith.cmpi eq, %arg0, %c0_i32_8 : i32
    %10 = arith.extui %9 : i1 to i32
    %c0_i32_9 = arith.constant 0 : i32
    %11 = arith.cmpi ne, %10, %c0_i32_9 : i32
    scf.if %11 {
      %c0_10 = arith.constant 0 : index
      %c0_11 = arith.constant 0 : index
      %12 = vector.load %arg3[%c0_10, %c0_11] : memref<24x128xf32, #tpu.memory_space<vmem>>, vector<24x128xf32>
      %13 = vector.extract_strided_slice %12 {offsets = [0, 0], sizes = [8, 128], strides = [1, 1]} : vector<24x128xf32> to vector<8x128xf32>
      %14 = vector.extract_strided_slice %12 {offsets = [8, 0], sizes = [8, 128], strides = [1, 1]} : vector<24x128xf32> to vector<8x128xf32>
      %15 = vector.extract_strided_slice %12 {offsets = [16, 0], sizes = [8, 128], strides = [1, 1]} : vector<24x128xf32> to vector<8x128xf32>
      %16 = arith.mulf %13, %13 : vector<8x128xf32>
      %cst_12 = arith.constant dense<0.000000e+00> : vector<8xf32>
      %17 = vector.multi_reduction <add>, %16, %cst_12 [1] : vector<8x128xf32> to vector<8xf32>
      %18 = vector.shape_cast %17 : vector<8xf32> to vector<8x1xf32>
      %cst_13 = arith.constant 1.000000e-24 : f32
      %19 = vector.broadcast %cst_13 : f32 to vector<8x1xf32>
      %20 = arith.maximumf %18, %19 : vector<8x1xf32>
      %21 = math.rsqrt %20 : vector<8x1xf32>
      %22 = vector.broadcast %21 : vector<8x1xf32> to vector<8x128xf32>
      %23 = arith.mulf %13, %22 : vector<8x128xf32>
      %24 = arith.mulf %14, %14 : vector<8x128xf32>
      %cst_14 = arith.constant dense<0.000000e+00> : vector<8xf32>
      %25 = vector.multi_reduction <add>, %24, %cst_14 [1] : vector<8x128xf32> to vector<8xf32>
      %26 = vector.shape_cast %25 : vector<8xf32> to vector<8x1xf32>
      %cst_15 = arith.constant 1.000000e-24 : f32
      %27 = vector.broadcast %cst_15 : f32 to vector<8x1xf32>
      %28 = arith.maximumf %26, %27 : vector<8x1xf32>
      %29 = math.rsqrt %28 : vector<8x1xf32>
      %30 = vector.broadcast %29 : vector<8x1xf32> to vector<8x128xf32>
      %31 = arith.mulf %14, %30 : vector<8x128xf32>
      %32 = arith.mulf %15, %15 : vector<8x128xf32>
      %cst_16 = arith.constant dense<0.000000e+00> : vector<8xf32>
      %33 = vector.multi_reduction <add>, %32, %cst_16 [1] : vector<8x128xf32> to vector<8xf32>
      %34 = vector.shape_cast %33 : vector<8xf32> to vector<8x1xf32>
      %cst_17 = arith.constant 1.000000e-24 : f32
      %35 = vector.broadcast %cst_17 : f32 to vector<8x1xf32>
      %36 = arith.maximumf %34, %35 : vector<8x1xf32>
      %37 = math.rsqrt %36 : vector<8x1xf32>
      %38 = vector.broadcast %37 : vector<8x1xf32> to vector<8x128xf32>
      %39 = arith.mulf %15, %38 : vector<8x128xf32>
      %40 = arith.mulf %39, %31 : vector<8x128xf32>
      %cst_18 = arith.constant dense<0.000000e+00> : vector<8xf32>
      %41 = vector.multi_reduction <add>, %40, %cst_18 [1] : vector<8x128xf32> to vector<8xf32>
      %42 = vector.shape_cast %41 : vector<8xf32> to vector<8x1xf32>
      %43 = arith.mulf %39, %23 : vector<8x128xf32>
      %cst_19 = arith.constant dense<0.000000e+00> : vector<8xf32>
      %44 = vector.multi_reduction <add>, %43, %cst_19 [1] : vector<8x128xf32> to vector<8xf32>
      %45 = vector.shape_cast %44 : vector<8xf32> to vector<8x1xf32>
      %46 = arith.mulf %31, %23 : vector<8x128xf32>
      %cst_20 = arith.constant dense<0.000000e+00> : vector<8xf32>
      %47 = vector.multi_reduction <add>, %46, %cst_20 [1] : vector<8x128xf32> to vector<8xf32>
      %48 = vector.shape_cast %47 : vector<8xf32> to vector<8x1xf32>
      %49 = tpu.iota {dimensions = array<i32: 0>} : vector<8x1xi32>
      %c2_i32 = arith.constant 2 : i32
      %50 = vector.broadcast %c2_i32 : i32 to vector<8x1xi32>
      %51 = arith.cmpi slt, %49, %50 : vector<8x1xi32>
      %52 = arith.extui %51 : vector<8x1xi1> to vector<8x1xi32>
      %53 = arith.sitofp %52 : vector<8x1xi32> to vector<8x1xf32>
      %cst_21 = arith.constant 1.000000e+00 : f32
      %54 = vector.broadcast %cst_21 : f32 to vector<8x1xf32>
      %55 = arith.subf %54, %42 : vector<8x1xf32>
      %56 = arith.mulf %55, %53 : vector<8x1xf32>
      %cst_22 = arith.constant dense<0.000000e+00> : vector<1xf32>
      %57 = vector.multi_reduction <add>, %56, %cst_22 [0] : vector<8x1xf32> to vector<1xf32>
      %58 = vector.shape_cast %57 : vector<1xf32> to vector<1x1xf32>
      %cst_23 = arith.constant 5.000000e-01 : f32
      %59 = vector.broadcast %cst_23 : f32 to vector<1x1xf32>
      %60 = arith.mulf %58, %59 : vector<1x1xf32>
      %61 = arith.subf %42, %48 : vector<8x1xf32>
      %62 = arith.mulf %61, %53 : vector<8x1xf32>
      %cst_24 = arith.constant dense<0.000000e+00> : vector<1xf32>
      %63 = vector.multi_reduction <add>, %62, %cst_24 [0] : vector<8x1xf32> to vector<1xf32>
      %64 = vector.shape_cast %63 : vector<1xf32> to vector<1x1xf32>
      %cst_25 = arith.constant 5.000000e-01 : f32
      %65 = vector.broadcast %cst_25 : f32 to vector<1x1xf32>
      %66 = arith.mulf %64, %65 : vector<1x1xf32>
      %67 = tpu.iota {dimensions = array<i32: 1>} : vector<8x128xi32>
      %c0_i32_26 = arith.constant 0 : i32
      %68 = vector.broadcast %c0_i32_26 : i32 to vector<8x128xi32>
      %69 = arith.cmpi eq, %67, %68 : vector<8x128xi32>
      %cst_27 = arith.constant 0.000000e+00 : f32
      %70 = vector.shape_cast %42 : vector<8x1xf32> to vector<8x1xf32>
      %71 = vector.broadcast %70 : vector<8x1xf32> to vector<8x128xf32>
      %72 = vector.broadcast %cst_27 : f32 to vector<8x128xf32>
      %73 = arith.select %69, %71, %72 : vector<8x128xi1>, vector<8x128xf32>
      %c1_i32 = arith.constant 1 : i32
      %74 = vector.broadcast %c1_i32 : i32 to vector<8x128xi32>
      %75 = arith.cmpi eq, %67, %74 : vector<8x128xi32>
      %76 = vector.shape_cast %45 : vector<8x1xf32> to vector<8x1xf32>
      %77 = vector.broadcast %76 : vector<8x1xf32> to vector<8x128xf32>
      %78 = arith.select %75, %77, %73 : vector<8x128xi1>, vector<8x128xf32>
      %c2_i32_28 = arith.constant 2 : i32
      %79 = vector.broadcast %c2_i32_28 : i32 to vector<8x128xi32>
      %80 = arith.cmpi eq, %67, %79 : vector<8x128xi32>
      %81 = vector.shape_cast %48 : vector<8x1xf32> to vector<8x1xf32>
      %82 = vector.broadcast %81 : vector<8x1xf32> to vector<8x128xf32>
      %83 = arith.select %80, %82, %78 : vector<8x128xi1>, vector<8x128xf32>
      %c3_i32 = arith.constant 3 : i32
      %84 = vector.broadcast %c3_i32 : i32 to vector<8x128xi32>
      %85 = arith.cmpi eq, %67, %84 : vector<8x128xi32>
      %86 = vector.shape_cast %60 : vector<1x1xf32> to vector<1x1xf32>
      %87 = vector.broadcast %86 : vector<1x1xf32> to vector<8x128xf32>
      %88 = arith.select %85, %87, %83 : vector<8x128xi1>, vector<8x128xf32>
      %c4_i32 = arith.constant 4 : i32
      %89 = vector.broadcast %c4_i32 : i32 to vector<8x128xi32>
      %90 = arith.cmpi eq, %67, %89 : vector<8x128xi32>
      %91 = vector.shape_cast %66 : vector<1x1xf32> to vector<1x1xf32>
      %92 = vector.broadcast %91 : vector<1x1xf32> to vector<8x128xf32>
      %93 = arith.select %90, %92, %88 : vector<8x128xi1>, vector<8x128xf32>
      %c0_29 = arith.constant 0 : index
      %c0_30 = arith.constant 0 : index
      %94 = vector.load %arg4[%c0_29, %c0_30] : memref<8x128xf32, #tpu.memory_space<vmem>>, vector<8x128xf32>
      tpu.vector_store %arg4[%c0_29, %c0_30], %93 {strides = array<i32>} : memref<8x128xf32, #tpu.memory_space<vmem>>, vector<8x128xf32>,
    } else {
    }
    return
  }
  func.func @transform_0(%arg0: i32) -> (i32, i32) {
    %c0_i32 = arith.constant 0 : i32
    %c0_i32_0 = arith.constant 0 : i32
    return %c0_i32, %arg0 : i32, i32
  }
  func.func @transform_1(%arg0: i32) -> (i32, i32) {
    %c0_i32 = arith.constant 0 : i32
    %c0_i32_0 = arith.constant 0 : i32
    return %arg0, %c0_i32 : i32, i32
  }
  func.func @transform_2(%arg0: i32) -> (i32, i32) {
    %c0_i32 = arith.constant 0 : i32
    %c0_i32_0 = arith.constant 0 : i32
    %c0_i32_1 = arith.constant 0 : i32
    return %c0_i32, %c0_i32_0 : i32, i32
  }
  func.func @transform_3(%arg0: i32) -> (i32, i32) {
    %c0_i32 = arith.constant 0 : i32
    %c0_i32_0 = arith.constant 0 : i32
    %c0_i32_1 = arith.constant 0 : i32
    return %c0_i32, %c0_i32_0 : i32, i32
  }
}

</mosaic_0001>

<bundles_post_ra>
// kernel: tpu_custom_call.1
= control target key start
LH: loop header
LB: loop body
LE: loop exit
PB: predicated region body
PF: predicated region fallthrough
CT: control target
= control target key end

     0   :  { %9 = vsyncpa [#allocation3], 0  ;;  %s1198_s0 = inlined_call_operand.hbm [shape: bf16[24,768], index: 0, kind: input, shape index: {}]   ;;  %s1199_s1 = inlined_call_operand.hbm [shape: bf16[768,128], index: 1, kind: input, shape index: {}]   ;;  %s1200_s2 = inlined_call_operand.hbm [shape: f32[24,128], index: 2, kind: output, shape index: {0}]   ;;  %s1201_s3 = inlined_call_operand.hbm [shape: f32[8,128], index: 3, kind: output, shape index: {1}]  }
   0x1   :  { %10 = vsyncpa [#allocation6], 0 }
   0x2   :  { %11 = vsyncpa [#allocation4], 0 }
   0x3   :  { %12 = vsyncpa [#allocation9], 0  ;;  %s17_s14 = sshll.u32 %s1198_s0, 4  ;;  %s1155_s15 = smov [#allocation2]   ;;  %s18_s14 = int_to_ptr.hbm [resolvable:$true] %s17_s14 }
   0x4   :  { %s19_s16 = sshll.u32 %s1155_s15, 4  ;;  %s30_s19 = sshll.u32 %s1199_s1, 4  ;;  %s20_s16 = int_to_ptr.vmem [resolvable:$true] %s19_s16  ;;  %s31_s19 = int_to_ptr.hbm [resolvable:$true] %s30_s19 }
   0x5   :  { %s1156_s20 = smov 384   ;;  %s1157_s21 = smov 24  }
   0x6   :  { %25 = dma.hbm_to_vmem [thread:$0]  %s18_s14, 1152, %s20_s16, [#allocation3], %s1156_s20, %s1156_s20, %s1157_s21  }
   0x7   :  { %s1158_s22 = smov [#allocation5]   ;;  %s1159_s24 = smov 64  }
   0x8   :  { %s32_s23 = sshll.u32 %s1158_s22, 4  ;;  %s1160_s25 = smov 4   ;;  %s33_s23 = int_to_ptr.vmem [resolvable:$true] %s32_s23 }
   0x9   :  { %38 = dma.hbm_to_vmem [thread:$0]  %s31_s19, 6144, %s33_s23, [#allocation6], %s1159_s24, %s1159_s24, %s1160_s25  }
   0xa   :  { %1147 = dma.done.wait [#allocation3], 1152  }
   0xb   :  { %1148 = vsyncadd [#allocation3], 4294966144 }
   0xc   :  { %1149 = dma.done.wait [#allocation6], 6144  }
   0xd   :  { %1150 = vsyncadd [#allocation6], 4294961152  ;;  %v977_v0 = vld [vmem:[#allocation5 + $0x38] sm:$0xff]  ;;  %v976_v4 = vld [vmem:[#allocation5 + $0x30] sm:$0xff]  ;;  %s717_s26 = sshll.u32 %s1200_s2, 4  ;;  %s1161_s27 = smov [#allocation7]   ;;  %s718_s26 = int_to_ptr.hbm [resolvable:$true] %s717_s26 }
   0xe   :  { %v985_v1 = vld [vmem:[#allocation5 + $0x78] sm:$0xff]  ;;  %501 = vmatpush.bf16.msra.mxu0 %v977_v0  ;;  %v984_v5 = vld [vmem:[#allocation5 + $0x70] sm:$0xff]  ;;  %v975_v8 = vld [vmem:[#allocation5 + $0x28] sm:$0xff]  ;;  %s715_s28 = sshll.u32 %s1161_s27, 4  ;;  %s1162_s29 = smov 128   ;;  %s716_s28 = int_to_ptr.vmem [resolvable:$true] %s715_s28 }
   0xf   :  { %v993_v2 = vld [vmem:[#allocation5 + $0xb8] sm:$0xff]  ;;  %519 = vmatpush.bf16.msra.mxu1 %v985_v1  ;;  %v992_v6 = vld [vmem:[#allocation5 + $0xb0] sm:$0xff]  ;;  %v983_v9 = vld [vmem:[#allocation5 + $0x68] sm:$0xff]  ;;  %s1163_s30 = smov 8   ;;  %s1165_s2 = smov [#allocation8]  }
  0x10   :  { %v1001_v3 = vld [vmem:[#allocation5 + $0xf8] sm:$0xff]  ;;  %537 = vmatpush.bf16.msra.mxu2 %v993_v2  ;;  %v1000_v7 = vld [vmem:[#allocation5 + $0xf0] sm:$0xff]  ;;  %v991_v10 = vld [vmem:[#allocation5 + $0xa8] sm:$0xff]  ;;  %s729_s4 = sshll.u32 %s1165_s2, 4  ;;  %s731_s7 = sshll.u32 %s1201_s3, 4  ;;  %s730_s4 = int_to_ptr.vmem [resolvable:$true] %s729_s4  ;;  %s732_s7 = int_to_ptr.hbm [resolvable:$true] %s731_s7 }
  0x11   :  { %555 = vmatpush.bf16.msra.mxu3 %v1001_v3  ;;  %v999_v11 = vld [vmem:[#allocation5 + $0xe8] sm:$0xff]  ;;  %v974_v12 = vld [vmem:[#allocation5 + $0x20] sm:$0xff]  ;;  %v973_v16 = vld [vmem:[#allocation5 + $0x18] sm:$0xff] }
  0x12   :  { %502 = vmatpush.bf16.msra.mxu0 %v976_v4  ;;  %v982_v13 = vld [vmem:[#allocation5 + $0x60] sm:$0xff]  ;;  %v981_v17 = vld [vmem:[#allocation5 + $0x58] sm:$0xff]  ;;  %v972_v20 = vld [vmem:[#allocation5 + $0x10] sm:$0xff] }
  0x13   :  { %520 = vmatpush.bf16.msra.mxu1 %v984_v5  ;;  %v990_v14 = vld [vmem:[#allocation5 + $0xa0] sm:$0xff]  ;;  %v989_v18 = vld [vmem:[#allocation5 + $0x98] sm:$0xff]  ;;  %v980_v21 = vld [vmem:[#allocation5 + $0x50] sm:$0xff] }
  0x14   :  { %538 = vmatpush.bf16.msra.mxu2 %v992_v6  ;;  %v998_v15 = vld [vmem:[#allocation5 + $0xe0] sm:$0xff]  ;;  %v997_v19 = vld [vmem:[#allocation5 + $0xd8] sm:$0xff]  ;;  %v988_v22 = vld [vmem:[#allocation5 + $0x90] sm:$0xff] }
  0x15   :  { %556 = vmatpush.bf16.msra.mxu3 %v1000_v7  ;;  %v996_v23 = vld [vmem:[#allocation5 + $0xd0] sm:$0xff]  ;;  %v971_v24 = vld [vmem:[#allocation5 + $0x8] sm:$0xff]  ;;  %v970_v28 = vld [vmem:[#allocation5] sm:$0xff] }
  0x16   :  { %503 = vmatpush.bf16.msra.mxu0 %v975_v8  ;;  %v979_v25 = vld [vmem:[#allocation5 + $0x48] sm:$0xff]  ;;  %v978_v29 = vld [vmem:[#allocation5 + $0x40] sm:$0xff]  ;;  %v749_v31 = vld [vmem:[#allocation2] sm:$0xf] }
  0x17   :  { %521 = vmatpush.bf16.msra.mxu1 %v983_v9  ;;  %v987_v26 = vld [vmem:[#allocation5 + $0x88] sm:$0xff]  ;;  %v986_v30 = vld [vmem:[#allocation5 + $0x80] sm:$0xff]  ;;  %v967_v32 = vld [vmem:[#allocation2 + $0x14] sm:$0xf0] }
  0x18   :  { %539 = vmatpush.bf16.msra.mxu2 %v991_v10  ;;  %v995_v27 = vld [vmem:[#allocation5 + $0xc8] sm:$0xff]  ;;  %v964_v33 = vld [vmem:[#allocation2 + $0x4] sm:$0xf]  ;;  %v751_v34 = vld [vmem:[#allocation2 + $0x18] sm:$0xf0]  ;;  %v750_v41 = vor.u32 %v967_v32, %v749_v31 }
  0x19   :  { %557 = vmatpush.bf16.msra.mxu3 %v999_v11  ;;  %v994_v35 = vld [vmem:[#allocation5 + $0xc0] sm:$0xff]  ;;  %v968_v37 = vld [vmem:[#allocation2 + $0x1c] sm:$0xf0]  ;;  %v759_v40 = vld [vmem:[#allocation2 + $0x20] sm:$0xf0]  ;;  %v754_v42 = vor.u32 %v964_v33, %v751_v34 }
  0x1a   :  { %504 = vmatpush.bf16.msra.mxu0 %v974_v12  ;;  %v757_v36 = vld [vmem:[#allocation2 + $0x8] sm:$0xf]  ;;  %v1009_v38 = vld [vmem:[#allocation5 + $0x138] sm:$0xff]  ;;  %v965_v39 = vld [vmem:[#allocation2 + $0xc] sm:$0xf] }
  0x1b   :  { %522 = vmatpush.bf16.msra.mxu1 %v982_v13  ;;  %v758_v43 = vor.u32 %v968_v37, %v757_v36  ;;  %v1017_v44 = vld [vmem:[#allocation5 + $0x178] sm:$0xff]  ;;  %v762_v45 = vor.u32 %v965_v39, %v759_v40  ;;  %v1008_v46 = vld [vmem:[#allocation5 + $0x130] sm:$0xff]  ;;  %v1007_v48 = vld [vmem:[#allocation5 + $0x128] sm:$0xff] }
  0x1c   :  { %540 = vmatpush.bf16.msra.mxu2 %v990_v14  ;;  %v1016_v47 = vld [vmem:[#allocation5 + $0x170] sm:$0xff]  ;;  %v1015_v49 = vld [vmem:[#allocation5 + $0x168] sm:$0xff]  ;;  %v1006_v52 = vld [vmem:[#allocation5 + $0x120] sm:$0xff] }
  0x1d   :  { %558 = vmatpush.bf16.msra.mxu3 %v998_v15  ;;  %v63_v50 = vld [vmem:[#allocation2 + $0x30] sm:$0xff]  ;;  %v64_v51 = vld [vmem:[#allocation2 + $0x38] sm:$0xff]  ;;  %v1014_v55 = vld [vmem:[#allocation5 + $0x160] sm:$0xff] }
  0x1e   :  { %505 = vmatpush.bf16.msra.mxu0 %v973_v16  ;;  %v183_v53 = vunpack.c.l.b16 %v63_v50  ;;  %v184_v54 = vunpack.c.h.b16 %v63_v50  ;;  %v185_v56 = vunpack.c.l.b16 %v64_v51  ;;  %v186_v57 = vunpack.c.h.b16 %v64_v51  ;;  %v1005_v58 = vld [vmem:[#allocation5 + $0x118] sm:$0xff]  ;;  %v1004_v0 = vld [vmem:[#allocation5 + $0x110] sm:$0xff]  ;;  %v1003_v2 = vld [vmem:[#allocation5 + $0x108] sm:$0xff] }
  0x1f   :  { %523 = vmatpush.bf16.msra.mxu1 %v981_v17  ;;  %v1013_v62 = vld [vmem:[#allocation5 + $0x158] sm:$0xff]  ;;  %v1012_v1 = vld [vmem:[#allocation5 + $0x150] sm:$0xff]  ;;  %v1011_v3 = vld [vmem:[#allocation5 + $0x148] sm:$0xff] }
  0x20   :  { %541 = vmatpush.bf16.msra.mxu2 %v989_v18  ;;  %v195_v59 = vpack.c.b16 %v183_v53, %v183_v53  ;;  %v196_v60 = vpack.c.b16 %v184_v54, %v184_v54  ;;  %v197_v61 = vpack.c.b16 %v185_v56, %v185_v56  ;;  %v198_v63 = vpack.c.b16 %v186_v57, %v186_v57  ;;  %v65_v4 = vld [vmem:[#allocation2 + $0x40] sm:$0xff]  ;;  %v1002_v5 = vld [vmem:[#allocation5 + $0x100] sm:$0xff]  ;;  %v765_v7 = vld [vmem:[#allocation2 + $0x10] sm:$0xf] }
  0x21   :  { %559 = vmatpush.bf16.msra.mxu3 %v997_v19  ;;  %v1010_v6 = vld [vmem:[#allocation5 + $0x140] sm:$0xff]  ;;  %v187_v9 = vunpack.c.l.b16 %v65_v4  ;;  %v966_v10 = vld [vmem:[#allocation2 + $0x14] sm:$0xf]  ;;  %v188_v12 = vunpack.c.h.b16 %v65_v4 }
  0x22   :  { %506 = vmatpush.bf16.msra.mxu0 %v972_v20  ;;  %v969_v8 = vld [vmem:[#allocation2 + $0x24] sm:$0xf0]  ;;  %v767_v11 = vld [vmem:[#allocation2 + $0x28] sm:$0xf0] }
  0x23   :  { %524 = vmatpush.bf16.msra.mxu1 %v980_v21  ;;  %v766_v13 = vor.u32 %v969_v8, %v765_v7  ;;  %v770_v14 = vor.u32 %v966_v10, %v767_v11  ;;  %v199_v15 = vpack.c.b16 %v187_v9, %v187_v9  ;;  %v200_v16 = vpack.c.b16 %v188_v12, %v188_v12 }
  0x24   :  { %542 = vmatpush.bf16.msra.mxu2 %v988_v22 }
  0x25   :  { %560 = vmatpush.bf16.msra.mxu3 %v996_v23 }
  0x26   :  { %507 = vmatpush.bf16.msra.mxu0 %v971_v24 }
  0x27   :  { %525 = vmatpush.bf16.msra.mxu1 %v979_v25 }
  0x28   :  { %543 = vmatpush.bf16.msra.mxu2 %v987_v26 }
  0x29   :  { %561 = vmatpush.bf16.msra.mxu3 %v995_v27 }
  0x2a   :  { %508 = vmatpush.bf16.msra.mxu0 %v970_v28 }
  0x2b   :  { %526 = vmatpush.bf16.msra.mxu1 %v978_v29 }
  0x2c   :  { %544 = vmatpush.bf16.msra.mxu2 %v986_v30 }
  0x2d   :  { %562 = vmatpush.bf16.msra.mxu3 %v994_v35  ;;  %509 = vmatmul.bf16.vlgmr.msra.gmra.mxu0 %v750_v41 }
  0x2e   :  { %573 = vmatpush.bf16.msrb.mxu0 %v1009_v38  ;;  %527 = vmatmul.bf16.vlgmr.msra.gmra.mxu1 %v754_v42 }
  0x2f   :  { %545 = vmatmul.bf16.vlgmr.msra.gmra.mxu2 %v758_v43  ;;  %591 = vmatpush.bf16.msrb.mxu1 %v1017_v44 }
  0x30   :  { %1018 = vmatpush.bf16.msrb.mxu2 %v1009_v38  ;;  %563 = vmatmul.bf16.vlgmr.msra.gmra.mxu3 %v762_v45 }
  0x31   :  { %1026 = vmatpush.bf16.msrb.mxu3 %v1017_v44 }
  0x32   :  { %574 = vmatpush.bf16.msrb.mxu0 %v1008_v46 }
  0x33   :  { %592 = vmatpush.bf16.msrb.mxu1 %v1016_v47 }
  0x34   :  { %1019 = vmatpush.bf16.msrb.mxu2 %v1008_v46 }
  0x35   :  { %1027 = vmatpush.bf16.msrb.mxu3 %v1016_v47 }
  0x36   :  { %575 = vmatpush.bf16.msrb.mxu0 %v1007_v48 }
  0x37   :  { %593 = vmatpush.bf16.msrb.mxu1 %v1015_v49 }
  0x38   :  { %1020 = vmatpush.bf16.msrb.mxu2 %v1007_v48 }
  0x39   :  { %1028 = vmatpush.bf16.msrb.mxu3 %v1015_v49 }
  0x3a   :  { %576 = vmatpush.bf16.msrb.mxu0 %v1006_v52 }
  0x3b   :  { %594 = vmatpush.bf16.msrb.mxu1 %v1014_v55 }
  0x3c   :  { %1021 = vmatpush.bf16.msrb.mxu2 %v1006_v52 }
  0x3d   :  { %1029 = vmatpush.bf16.msrb.mxu3 %v1014_v55  ;;  %514 = vmatmul.bf16.gmra.mxu0 %v195_v59 }
  0x3e   :  { %577 = vmatpush.bf16.msrb.mxu0 %v1005_v58  ;;  %532 = vmatmul.bf16.gmra.mxu1 %v196_v60 }
  0x3f   :  { %550 = vmatmul.bf16.gmra.mxu2 %v197_v61  ;;  %595 = vmatpush.bf16.msrb.mxu1 %v1013_v62 }
  0x40   :  { %1022 = vmatpush.bf16.msrb.mxu2 %v1005_v58  ;;  %568 = vmatmul.bf16.gmra.mxu3 %v198_v63 }
  0x41   :  { %1030 = vmatpush.bf16.msrb.mxu3 %v1013_v62 }
  0x42   :  { %578 = vmatpush.bf16.msrb.mxu0 %v1004_v0 }
  0x43   :  { %596 = vmatpush.bf16.msrb.mxu1 %v1012_v1 }
  0x44   :  { %1023 = vmatpush.bf16.msrb.mxu2 %v1004_v0 }
  0x45   :  { %1031 = vmatpush.bf16.msrb.mxu3 %v1012_v1 }
  0x46   :  { %579 = vmatpush.bf16.msrb.mxu0 %v1003_v2 }
  0x47   :  { %597 = vmatpush.bf16.msrb.mxu1 %v1011_v3 }
  0x48   :  { %1024 = vmatpush.bf16.msrb.mxu2 %v1003_v2 }
  0x49   :  { %1032 = vmatpush.bf16.msrb.mxu3 %v1011_v3 }
  0x4a   :  { %580 = vmatpush.bf16.msrb.mxu0 %v1002_v5 }
  0x4b   :  { %598 = vmatpush.bf16.msrb.mxu1 %v1010_v6 }
  0x4c   :  { %1025 = vmatpush.bf16.msrb.mxu2 %v1002_v5 }
  0x4d   :  { %1033 = vmatpush.bf16.msrb.mxu3 %v1010_v6  ;;  %581 = vmatmul.bf16.vlgmr.msrb.gmra.mxu0 %v766_v13 }
  0x4e   :  { %599 = vmatmul.bf16.vlgmr.msrb.gmra.mxu1 %v770_v14 }
  0x4f   :  { %586 = vmatmul.bf16.vlgmr.msrb.gmra.mxu2 %v199_v15 }
  0x50   :  { %604 = vmatmul.bf16.vlgmr.msrb.gmra.mxu3 %v200_v16 }
  0xaa   :  { %v510_v17 = vpop.f32.mrf.mxu0 }
  0xab   :  { %v528_v18 = vpop.f32.mrf.mxu1 }
  0xac   :  { %v529_v30 = vadd.f32 %v528_v18, %v510_v17 }
  0xb2   :  { %v546_v19 = vpop.f32.mrf.mxu2  ;;  %v512_v20 = vpop.f32.mrf.mxu0 }
  0xb3   :  { %v530_v21 = vpop.f32.mrf.mxu1  ;;  %v564_v22 = vpop.f32.mrf.mxu3  ;;  %v547_v32 = vadd.f32 %v546_v19, %v529_v30 }
  0xb4   :  { %v531_v38 = vadd.f32 %v530_v21, %v512_v20 }
  0xb5   :  { %v565_v33 = vadd.f32 %v564_v22, %v547_v32 }
  0xba   :  { %v548_v23 = vpop.f32.mrf.mxu2  ;;  %v515_v24 = vpop.f32.mrf.mxu0 }
  0xbb   :  { %v533_v25 = vpop.f32.mrf.mxu1  ;;  %v566_v26 = vpop.f32.mrf.mxu3  ;;  %v549_v42 = vadd.f32 %v548_v23, %v531_v38 }
  0xbc   :  { %v534_v35 = vadd.f32 %v533_v25, %v515_v24 }
  0xbd   :  { %v567_v45 = vadd.f32 %v566_v26, %v549_v42 }
  0xc2   :  { %v551_v27 = vpop.f32.mrf.mxu2  ;;  %v517_v28 = vpop.f32.mrf.mxu0 }
  0xc3   :  { %v535_v29 = vpop.f32.mrf.mxu1  ;;  %v569_v31 = vpop.f32.mrf.mxu3  ;;  %v552_v41 = vadd.f32 %v551_v27, %v534_v35  ;;  %v675_v28 = vlaneseq }
  0xc5   :  { %v570_v44 = vadd.f32 %v569_v31, %v552_v41  ;;  %v676_v29 = vshrl.u32 %v675_v28, 7  ;;  %v1164_v31 = vmov 0.0   ;;  %v699_v38 = vand.u32 127, %v675_v28 }
  0xc7   :  { %vm677_vm9 = vcmp.lt.s32.totalorder %v676_v29, 2  ;;  %vm700_vm10 = vcmp.eq.s32.totalorder %v699_v38, 0  ;;  %vm702_vm11 = vcmp.eq.s32.totalorder %v699_v38, 1  ;;  %vm704_vm12 = vcmp.eq.s32.totalorder %v699_v38, 2 }
  0xc8   :  { %v963_v32 = vsel %vm677_vm9, 1.0, %v1164_v31  ;;  %vm706_vm13 = vcmp.eq.s32.totalorder %v699_v38, 3  ;;  %vm708_vm14 = vcmp.eq.s32.totalorder %v699_v38, 4 }
  0xca   :  { %v553_v34 = vpop.f32.mrf.mxu2  ;;  %v582_v36 = vpop.f32.mrf.mxu0 }
  0xcb   :  { %v600_v37 = vpop.f32.mrf.mxu1  ;;  %v571_v39 = vpop.f32.mrf.mxu3  ;;  %v583_v40 = vadd.f32 %v582_v36, %v565_v33 }
  0xcd   :  { %v601_v43 = vadd.f32 %v600_v37, %v583_v40 }
  0xcf   :  { %612 = vst [vmem:[#allocation7] sm:$0xff] %v601_v43  ;;  %v621_v47 = vmul.f32 %v601_v43, %v601_v43 }
  0xd1   :  { %622 = vadd.xlane.f32.xlu1 %v621_v47 }
  0xd2   :  { %v587_v46 = vpop.f32.mrf.mxu2  ;;  %v584_v49 = vpop.f32.mrf.mxu0 }
  0xd3   :  { %v588_v48 = vadd.f32 %v587_v46, %v570_v44  ;;  %v585_v50 = vadd.f32 %v584_v49, %v567_v45  ;;  %v605_v51 = vpop.f32.mrf.mxu3  ;;  %v602_v52 = vpop.f32.mrf.mxu1 }
  0xd5   :  { %v606_v53 = vadd.f32 %v605_v51, %v588_v48  ;;  %v603_v54 = vadd.f32 %v602_v52, %v585_v50 }
  0xd7   :  { %614 = vst [vmem:[#allocation7 + $0x10] sm:$0xff] %v606_v53  ;;  %v636_v56 = vmul.f32 %v603_v54, %v603_v54  ;;  %v651_v58 = vmul.f32 %v606_v53, %v606_v53 }
  0xd8   :  { %613 = vst [vmem:[#allocation7 + $0x8] sm:$0xff] %v603_v54 }
  0xd9   :  { %637 = vadd.xlane.f32.xlu0 %v636_v56  ;;  %723 = dma.vmem_to_hbm [thread:$0]  %s716_s28, 384, %s718_s26, [#allocation4], %s1162_s29, %s1162_s29, %s1163_s30  }
  0xda   :  { %v589_v55 = vpop.f32.mrf.mxu2 }
  0xdb   :  { %v607_v57 = vpop.f32.mrf.mxu3 }
  0xe1   :  { %652 = vadd.xlane.f32.xlu0 %v651_v58 }
 0x144   :  { %v623_v59 = vpop.xlane.xlu1 %622 }
 0x145   :  { %v624_v60 = vmax.f32 %v623_v59, 1e-24 }
 0x147   :  { %1045 = vrsqrt.f32 %v624_v60  ;;  %vm631_vm1 = vweird.f32 %v624_v60 }
 0x14c   :  { %v638_v61 = vpop.xlane.xlu0 %637 }
 0x14d   :  { %v1046_v62 = vpop.eup %1045  ;;  %v639_v63 = vmax.f32 %v638_v61, 1e-24 }
 0x14e   :  { %v626_v0 = vmul.f32 %v1046_v62, %v624_v60  ;;  %vm632_vm0 = vweird.f32 %v1046_v62 }
 0x14f   :  { %1047 = vrsqrt.f32 %v639_v63  ;;  %vm633_vm3 = vmor %vm631_vm1, %vm632_vm0  ;;  %vm646_vm4 = vweird.f32 %v639_v63 }
 0x150   :  { %v627_v1 = vmul.f32 %v1046_v62, %v626_v0 }
 0x152   :  { %v628_v2 = vmul.f32 0.5, %v627_v1 }
 0x154   :  { %v653_v3 = vpop.xlane.xlu0 %652  ;;  %v629_v6 = vsub.f32 1.5, %v628_v2 }
 0x155   :  { %v1048_v4 = vpop.eup %1047  ;;  %v654_v5 = vmax.f32 %v653_v3, 1e-24 }
 0x156   :  { %v641_v7 = vmul.f32 %v1048_v4, %v639_v63  ;;  %v630_v10 = vmul.f32 %v1046_v62, %v629_v6  ;;  %vm647_vm2 = vweird.f32 %v1048_v4 }
 0x157   :  { %1049 = vrsqrt.f32 %v654_v5  ;;  %vm648_vm5 = vmor %vm646_vm4, %vm647_vm2  ;;  %vm661_vm7 = vweird.f32 %v654_v5 }
 0x158   :  { %v642_v8 = vmul.f32 %v1048_v4, %v641_v7  ;;  %v634_v14 = vsel %vm633_vm3, %v1046_v62, %v630_v10 }
 0x159   :  { %v635_v18 = vmul.f32 %v634_v14, %v601_v43 }
 0x15a   :  { %v643_v9 = vmul.f32 0.5, %v642_v8 }
 0x15c   :  { %v644_v11 = vsub.f32 1.5, %v643_v9 }
 0x15d   :  { %v1050_v12 = vpop.eup %1049 }
 0x15e   :  { %v656_v13 = vmul.f32 %v1050_v12, %v654_v5  ;;  %v645_v15 = vmul.f32 %v1048_v4, %v644_v11  ;;  %vm662_vm6 = vweird.f32 %v1050_v12 }
 0x15f   :  { %vm663_vm8 = vmor %vm661_vm7, %vm662_vm6 }
 0x160   :  { %v657_v16 = vmul.f32 %v1050_v12, %v656_v13  ;;  %v649_v17 = vsel %vm648_vm5, %v1048_v4, %v645_v15 }
 0x161   :  { %v650_v19 = vmul.f32 %v649_v17, %v603_v54 }
 0x162   :  { %v658_v20 = vmul.f32 0.5, %v657_v16 }
 0x163   :  { %v672_v21 = vmul.f32 %v650_v19, %v635_v18 }
 0x164   :  { %v659_v22 = vsub.f32 1.5, %v658_v20 }
 0x165   :  { %673 = vadd.xlane.f32.xlu2 %v672_v21 }
 0x166   :  { %v660_v23 = vmul.f32 %v1050_v12, %v659_v22 }
 0x168   :  { %v664_v24 = vsel %vm663_vm8, %v1050_v12, %v660_v23 }
 0x169   :  { %v665_v25 = vmul.f32 %v664_v24, %v606_v53 }
 0x16b   :  { %v666_v26 = vmul.f32 %v665_v25, %v650_v19  ;;  %v669_v27 = vmul.f32 %v665_v25, %v635_v18 }
 0x16d   :  { %667 = vadd.xlane.f32.xlu1 %v666_v26  ;;  %670 = vadd.xlane.f32.xlu2 %v669_v27 }
 0x1d8   :  { %v674_v30 = vpop.xlane.xlu2 %673 }
 0x1e0   :  { %v668_v33 = vpop.xlane.xlu1 %667  ;;  %v671_v47 = vpop.xlane.xlu2 %670 }
 0x1e1   :  { %v680_v34 = vsub.f32 1.0, %v668_v33  ;;  %v689_v35 = vsub.f32 %v668_v33, %v674_v30  ;;  %v701_v48 = vsel %vm700_vm10, %v668_v33, 0.0 }
 0x1e2   :  { %v703_v52 = vsel %vm702_vm11, %v671_v47, %v701_v48 }
 0x1e3   :  { %v681_v36 = vmul.f32 %v963_v32, %v680_v34  ;;  %v690_v37 = vmul.f32 %v963_v32, %v689_v35  ;;  %v705_v56 = vsel %vm704_vm12, %v674_v30, %v703_v52 }
 0x1e5   :  { %v682_v39 = vrot.slane %v681_v36, 4  ;;  %v691_v40 = vrot.slane %v690_v37, 4 }
 0x1e7   :  { %v683_v41 = vadd.f32 %v682_v39, %v681_v36  ;;  %v692_v42 = vadd.f32 %v691_v40, %v690_v37 }
 0x1e9   :  { %v684_v43 = vrot.slane %v683_v41, 2  ;;  %v693_v44 = vrot.slane %v692_v42, 2 }
 0x1eb   :  { %v685_v45 = vadd.f32 %v684_v43, %v683_v41  ;;  %v694_v46 = vadd.f32 %v693_v44, %v692_v42 }
 0x1ed   :  { %v686_v49 = vrot.slane %v685_v45, 1  ;;  %v695_v50 = vrot.slane %v694_v46, 1 }
 0x1ef   :  { %v687_v51 = vadd.f32 %v686_v49, %v685_v45  ;;  %v696_v53 = vadd.f32 %v695_v50, %v694_v46 }
 0x1f1   :  { %v688_v54 = vmul.f32 0.5, %v687_v51  ;;  %v697_v55 = vmul.f32 0.5, %v696_v53 }
 0x1f3   :  { %v707_v57 = vsel %vm706_vm13, %v688_v54, %v705_v56 }
 0x1f4   :  { %v709_v58 = vsel %vm708_vm14, %v697_v55, %v707_v57 }
 0x1f5   :  { %710 = vst [vmem:[#allocation8] sm:$0xff] %v709_v58 }
 0x1f6   :  { %734 = dma.vmem_to_hbm [thread:$0]  %s730_s4, 128, %s732_s7, [#allocation9]  }
 0x1f7   :  { %1151 = dma.done.wait [#allocation4], 384  }
 0x1f8   :  { %1152 = vsyncadd [#allocation4], 4294966912 }
 0x1f9   :  { %1153 = dma.done.wait [#allocation9], 128  }
 0x1fa   :  { %1154 = vsyncadd [#allocation9], 4294967168 }
 0x1fb   :  { %743 = vsyncpa [#allocation3], 1 }
 0x1fc   :  { %744 = vsyncpa [#allocation6], 1 }
 0x1fd   :  { %745 = vsyncpa [#allocation4], 1 }
 0x1fe   :  { %746 = vsyncpa [#allocation9], 1 }

</bundles_post_ra>
